<compile_context>
chip_gen: v7x
topology: tpu7x:2x2x1
jax: 0.10.0
libtpu: 0.0.40
codegen_flags: <defaults>
</compile_context>

<pallas_src>
import functools

import jax
import jax.numpy as jnp
from jax.experimental import pallas as pl
from jax.experimental.pallas import tpu as pltpu


def _wce_kernel(x_ref, t_ref, w_ref, num_ref, den_ref, num_acc, den_acc, *,
                n_classes, ignore_index, label_smoothing):
    """One (tile_n, C) tile of rows: fused logsumexp + weighted NLL + smoothing."""
    t_idx = pl.program_id(1)

    @pl.when(t_idx == 0)
    def _init():
        num_acc[...] = jnp.zeros_like(num_acc)
        den_acc[...] = jnp.zeros_like(den_acc)

    x = x_ref[...].astype(jnp.float32)            # (TN, C) logits, cast in VMEM
    t = t_ref[...]                                # (TN, 1) int32 targets
    w = w_ref[...].astype(jnp.float32)            # (1,  C) class weights

    # log-sum-exp along the class (lane) axis
    m = jnp.max(x, axis=-1, keepdims=True)
    lse = m + jnp.log(jnp.sum(jnp.exp(x - m), axis=-1, keepdims=True))   # (TN, 1)

    cls_iota = jax.lax.broadcasted_iota(jnp.int32, x.shape, 1)           # (TN, C)
    onehot = (cls_iota == t).astype(jnp.float32)                         # (TN, C)

    x_y = jnp.sum(onehot * x, axis=-1, keepdims=True)     # logit at target  (TN,1)
    w_y = jnp.sum(onehot * w, axis=-1, keepdims=True)     # weight at target (TN,1)
    wx = jnp.sum(w * x, axis=-1, keepdims=True)           # sum_c w_c x_c    (TN,1)
    w_sum = jnp.sum(w, axis=-1, keepdims=True)            # W_sum            (1,1)

    eps = jnp.float32(label_smoothing)
    nll_y = lse - x_y                                     # -log p at target
    smooth = w_sum * lse - wx                             # sum_c w_c * (-log p_c)
    per = (1.0 - eps) * w_y * nll_y + (eps / jnp.float32(n_classes)) * smooth

    # Mask ignore_index rows AND ragged/padded tail rows (their targets were padded
    # with ignore_index).  jnp.where is a select, so garbage logits read from the
    # out-of-bounds tail cannot leak NaN/Inf into the accumulators.
    valid = t != ignore_index                             # (TN, 1) bool
    num_acc[...] += jnp.where(valid, per, 0.0)
    den_acc[...] += jnp.where(valid, w_y, 0.0)

    @pl.when(t_idx == pl.num_programs(1) - 1)
    def _finalize():
        num_ref[...] = jnp.sum(num_acc[...], keepdims=True)   # (1, 1)
        den_ref[...] = jnp.sum(den_acc[...], keepdims=True)   # (1, 1)


def _round_up(x, m):
    return ((x + m - 1) // m) * m


def _choose_tile_n(n_rows, n_classes, target_f32_bytes=2 * 1024 * 1024,
                   max_rows=8192):
    """N-tile: multiple of 8 sublanes, ~2 MiB of f32 compute per tile, capped."""
    rows = max(8, target_f32_bytes // (n_classes * 4))
    rows = min(rows, max_rows, _round_up(n_rows, 8))
    return int(max(8, (rows // 8) * 8))


def make_class_weights(cls_num_pts, ignore_index, normal_w=True):
    """Mirrors WeightedCrossEntropyLoss.__init__ weight construction (plain JAX glue)."""
    cls_num = jnp.asarray(cls_num_pts, dtype=jnp.float32)
    f_c = cls_num / jnp.sum(cls_num)
    weights = 1.0 / jnp.sqrt(f_c)
    weights = weights.at[ignore_index].set(0.0)
    if normal_w:
        weights = weights / jnp.sum(weights) * cls_num.shape[0]
    weights = weights / (jnp.sum(weights * cls_num) / jnp.sum(cls_num))
    return weights


def weighted_cross_entropy_loss(logits, target, weights, ignore_index,
                                label_smoothing, *, tile_n=None, num_slices=2):
    """Forward pass of WeightedCrossEntropyLoss (reduction='mean') on TPU."""
    N, C = logits.shape
    ignore_index = int(ignore_index)

    if tile_n is None:
        tile_n = _choose_tile_n(N, C)
    tile_n = int(max(8, min(_round_up(tile_n, 8), _round_up(N, 8))))

    total_tiles = pl.cdiv(N, tile_n)
    num_slices = int(max(1, min(num_slices, total_tiles)))
    tiles_per_slice = pl.cdiv(total_tiles, num_slices)
    padded_tiles = num_slices * tiles_per_slice
    rows_padded = padded_tiles * tile_n

    # Only the (tiny) int32 target vector is padded; padded rows carry ignore_index
    # and contribute nothing.  The (N, C) logits are NOT padded and NOT up-cast.
    t2 = jnp.pad(target.astype(jnp.int32), (0, rows_padded - N),
                 constant_values=ignore_index).reshape(rows_padded, 1)
    w2 = weights.astype(jnp.float32).reshape(1, C)

    kernel = functools.partial(
        _wce_kernel,
        n_classes=C,
        ignore_index=ignore_index,
        label_smoothing=float(label_smoothing),
    )

    def logits_map(p, t):
        # Clamp the (at most num_slices-1) fully-out-of-range padding tiles onto the
        # last real tile; their targets are all ignore_index so the redundant read
        # contributes nothing and never DMAs past the logits array.
        tile = jnp.minimum(p * tiles_per_slice + t, total_tiles - 1)
        return (tile, 0)

    def target_map(p, t):
        return (p * tiles_per_slice + t, 0)

    # VMEM budget: double-buffered native-dtype input tile + a handful of f32
    # (tile_n, C) temporaries.  v5e's default scoped limit is only 16 MiB -> raise.
    in_bytes = tile_n * C * jnp.dtype(logits.dtype).itemsize
    f32_bytes = tile_n * C * 4
    vmem_est = 2 * in_bytes + 8 * f32_bytes + 4 * tile_n * 4 + (1 << 20)
    vmem_limit = int(min(48 * 2 ** 20, max(32 * 2 ** 20, vmem_est)))

    num, den = pl.pallas_call(
        kernel,
        out_shape=(jax.ShapeDtypeStruct((num_slices, 1, 1), jnp.float32),
                   jax.ShapeDtypeStruct((num_slices, 1, 1), jnp.float32)),
        grid_spec=pltpu.PrefetchScalarGridSpec(
            num_scalar_prefetch=0,
            grid=(num_slices, tiles_per_slice),
            in_specs=[
                pl.BlockSpec((tile_n, C), logits_map),       # logits tile (native dtype)
                pl.BlockSpec((tile_n, 1), target_map),       # target tile
                pl.BlockSpec((1, C), lambda p, t: (0, 0)),   # class weights (resident)
            ],
            out_specs=(
                pl.BlockSpec((None, 1, 1), lambda p, t: (p, 0, 0)),  # per-slice num
                pl.BlockSpec((None, 1, 1), lambda p, t: (p, 0, 0)),  # per-slice den
            ),
            scratch_shapes=[pltpu.VMEM((tile_n, 1), jnp.float32),    # num partials
                            pltpu.VMEM((tile_n, 1), jnp.float32)],   # den partials
        ),
        compiler_params=pltpu.CompilerParams(
            dimension_semantics=("parallel", "arbitrary"),
            vmem_limit_bytes=vmem_limit),
    )(logits, t2, w2)

    # NOTE: like PyTorch, returns NaN if every target is ignore_index (den == 0).
    return jnp.sum(num) / jnp.sum(den)


def _reference_loss(logits, target, weights, ignore_index, label_smoothing):
    """Pure-JAX reference mirroring nn.CrossEntropyLoss(weight, ignore_index,
    label_smoothing, reduction='mean')."""
    x = logits.astype(jnp.float32)
    C = x.shape[-1]
    logp = jax.nn.log_softmax(x, axis=-1)
    valid = target != ignore_index
    w_y = weights[target]
    logp_y = jnp.take_along_axis(logp, target[:, None].astype(jnp.int32), axis=-1)[:, 0]
    smooth = jnp.sum(weights[None, :] * (-logp), axis=-1)
    eps = label_smoothing
    per = (1.0 - eps) * w_y * (-logp_y) + (eps / C) * smooth
    num = jnp.sum(jnp.where(valid, per, 0.0))
    den = jnp.sum(jnp.where(valid, w_y, 0.0))
    return num / den


if __name__ == "__main__":
    key = jax.random.PRNGKey(0)
    N, C = 300, 8                      # deliberately NOT a multiple of the tile size
    ignore_index = 0
    label_smoothing = 0.1
    cls_num_pts = [100.0, 2000.0, 500.0, 50.0, 800.0, 1200.0, 300.0, 150.0]

    k1, k2 = jax.random.split(key)
    logits = jax.random.normal(k1, (N, C), dtype=jnp.float32)
    target = jax.random.randint(k2, (N,), 0, C, dtype=jnp.int32)

    weights = make_class_weights(cls_num_pts, ignore_index, normal_w=True)

    # Small tile_n / num_slices=2 exercises the ragged tail tile, the clamped
    # padding tile and the per-slice partial outputs at this small problem size.
    loss = weighted_cross_entropy_loss(logits, target, weights, ignore_index,
                                       label_smoothing, tile_n=64, num_slices=2)
    loss = jax.block_until_ready(loss)

    ref = jax.block_until_ready(
        _reference_loss(logits, target, weights, ignore_index, label_smoothing))
    err = abs(float(loss) - float(ref))
    if not (err <= 1e-3 * max(1.0, abs(float(ref)))):
        raise AssertionError(f"kernel={float(loss)!r} ref={float(ref)!r} err={err!r}")
    print("KERNEL_OK")
</pallas_src>

<mosaic_0001>
module attributes {stable_mosaic.version = 11 : i64} {
  func.func @_wce_kernel(%arg0: i32, %arg1: i32, %arg2: memref<64x8xf32, #tpu.memory_space<vmem>>, %arg3: memref<64x1xi32, #tpu.memory_space<vmem>>, %arg4: memref<1x8xf32, #tpu.memory_space<vmem>>, %arg5: memref<1x1x1xf32, #tpu.memory_space<vmem>>, %arg6: memref<1x1x1xf32, #tpu.memory_space<vmem>>, %arg7: memref<64x1xf32, #tpu.memory_space<vmem>>, %arg8: memref<64x1xf32, #tpu.memory_space<vmem>>) attributes {dimension_semantics = [#tpu.dimension_semantics<parallel>, #tpu.dimension_semantics<arbitrary>], iteration_bounds = array<i64: 2, 3>, scalar_prefetch = 0 : i64, scratch_operands = 2 : i64, tpu.core_type = #tpu.core_type<tc>, window_params = [{transform_indices = @transform_0, window_bounds = array<i64: 64, 8>}, {transform_indices = @transform_1, window_bounds = array<i64: 64, 1>}, {pipeline_mode = #tpu.pipeline_mode<synchronous>, transform_indices = @transform_2, window_bounds = array<i64: 1, 8>}, {transform_indices = @transform_3, window_bounds = array<i64: 1, 1, 1>}, {transform_indices = @transform_4, window_bounds = array<i64: 1, 1, 1>}]} {
    %c0_i32 = arith.constant 0 : i32
    %0 = arith.cmpi eq, %arg1, %c0_i32 : i32
    %1 = arith.extui %0 : i1 to i32
    %c0_i32_0 = arith.constant 0 : i32
    %2 = arith.cmpi ne, %1, %c0_i32_0 : i32
    scf.if %2 {
      %cst_27 = arith.constant 0.000000e+00 : f32
      %60 = vector.broadcast %cst_27 : f32 to vector<64x1xf32>
      %c0_28 = arith.constant 0 : index
      %c0_29 = arith.constant 0 : index
      %61 = vector.load %arg7[%c0_28, %c0_29] : memref<64x1xf32, #tpu.memory_space<vmem>>, vector<64x1xf32>
      tpu.vector_store %arg7[%c0_28, %c0_29], %60 {strides = array<i32>} : memref<64x1xf32, #tpu.memory_space<vmem>>, vector<64x1xf32>,
      %cst_30 = arith.constant 0.000000e+00 : f32
      %62 = vector.broadcast %cst_30 : f32 to vector<64x1xf32>
      %c0_31 = arith.constant 0 : index
      %c0_32 = arith.constant 0 : index
      %63 = vector.load %arg8[%c0_31, %c0_32] : memref<64x1xf32, #tpu.memory_space<vmem>>, vector<64x1xf32>
      tpu.vector_store %arg8[%c0_31, %c0_32], %62 {strides = array<i32>} : memref<64x1xf32, #tpu.memory_space<vmem>>, vector<64x1xf32>,
    } else {
    }
    %c0 = arith.constant 0 : index
    %c0_1 = arith.constant 0 : index
    %3 = vector.load %arg2[%c0, %c0_1] : memref<64x8xf32, #tpu.memory_space<vmem>>, vector<64x8xf32>
    %c0_2 = arith.constant 0 : index
    %c0_3 = arith.constant 0 : index
    %4 = vector.load %arg3[%c0_2, %c0_3] : memref<64x1xi32, #tpu.memory_space<vmem>>, vector<64x1xi32>
    %c0_4 = arith.constant 0 : index
    %c0_5 = arith.constant 0 : index
    %5 = vector.load %arg4[%c0_4, %c0_5] : memref<1x8xf32, #tpu.memory_space<vmem>>, vector<1x8xf32>
    %cst = arith.constant dense<0xFF800000> : vector<64xf32>
    %6 = vector.multi_reduction <maximumf>, %3, %cst [1] : vector<64x8xf32> to vector<64xf32>
    %7 = vector.shape_cast %6 : vector<64xf32> to vector<64x1xf32>
    %8 = vector.broadcast %7 : vector<64x1xf32> to vector<64x8xf32>
    %9 = arith.subf %3, %8 : vector<64x8xf32>
    %10 = math.exp %9 : vector<64x8xf32>
    %cst_6 = arith.constant dense<0.000000e+00> : vector<64xf32>
    %11 = vector.multi_reduction <add>, %10, %cst_6 [1] : vector<64x8xf32> to vector<64xf32>
    %12 = vector.shape_cast %11 : vector<64xf32> to vector<64x1xf32>
    %13 = math.log %12 : vector<64x1xf32>
    %14 = arith.addf %7, %13 : vector<64x1xf32>
    %15 = tpu.iota {dimensions = array<i32: 1>} : vector<64x8xi32>
    %16 = vector.broadcast %4 : vector<64x1xi32> to vector<64x8xi32>
    %17 = arith.cmpi eq, %15, %16 : vector<64x8xi32>
    %18 = arith.extui %17 : vector<64x8xi1> to vector<64x8xi32>
    %19 = arith.sitofp %18 : vector<64x8xi32> to vector<64x8xf32>
    %20 = arith.mulf %19, %3 : vector<64x8xf32>
    %cst_7 = arith.constant dense<0.000000e+00> : vector<64xf32>
    %21 = vector.multi_reduction <add>, %20, %cst_7 [1] : vector<64x8xf32> to vector<64xf32>
    %22 = vector.shape_cast %21 : vector<64xf32> to vector<64x1xf32>
    %23 = vector.broadcast %5 : vector<1x8xf32> to vector<64x8xf32>
    %24 = arith.mulf %19, %23 : vector<64x8xf32>
    %cst_8 = arith.constant dense<0.000000e+00> : vector<64xf32>
    %25 = vector.multi_reduction <add>, %24, %cst_8 [1] : vector<64x8xf32> to vector<64xf32>
    %26 = vector.shape_cast %25 : vector<64xf32> to vector<64x1xf32>
    %27 = vector.broadcast %5 : vector<1x8xf32> to vector<64x8xf32>
    %28 = arith.mulf %27, %3 : vector<64x8xf32>
    %cst_9 = arith.constant dense<0.000000e+00> : vector<64xf32>
    %29 = vector.multi_reduction <add>, %28, %cst_9 [1] : vector<64x8xf32> to vector<64xf32>
    %30 = vector.shape_cast %29 : vector<64xf32> to vector<64x1xf32>
    %cst_10 = arith.constant dense<0.000000e+00> : vector<1xf32>
    %31 = vector.multi_reduction <add>, %5, %cst_10 [1] : vector<1x8xf32> to vector<1xf32>
    %32 = vector.shape_cast %31 : vector<1xf32> to vector<1x1xf32>
    %33 = arith.subf %14, %22 : vector<64x1xf32>
    %34 = vector.broadcast %32 : vector<1x1xf32> to vector<64x1xf32>
    %35 = arith.mulf %34, %14 : vector<64x1xf32>
    %36 = arith.subf %35, %30 : vector<64x1xf32>
    %cst_11 = arith.constant 1.000000e+00 : f32
    %cst_12 = arith.constant 1.000000e-01 : f32
    %37 = arith.subf %cst_11, %cst_12 : f32
    %38 = vector.broadcast %37 : f32 to vector<64x1xf32>
    %39 = arith.mulf %38, %26 : vector<64x1xf32>
    %40 = arith.mulf %39, %33 : vector<64x1xf32>
    %cst_13 = arith.constant 1.000000e-01 : f32
    %cst_14 = arith.constant 8.000000e+00 : f32
    %41 = arith.divf %cst_13, %cst_14 : f32
    %42 = vector.broadcast %41 : f32 to vector<64x1xf32>
    %43 = arith.mulf %42, %36 : vector<64x1xf32>
    %44 = arith.addf %40, %43 : vector<64x1xf32>
    %c0_i32_15 = arith.constant 0 : i32
    %45 = vector.broadcast %c0_i32_15 : i32 to vector<64x1xi32>
    %46 = arith.cmpi ne, %4, %45 : vector<64x1xi32>
    %c0_16 = arith.constant 0 : index
    %c0_17 = arith.constant 0 : index
    %47 = vector.load %arg7[%c0_16, %c0_17] : memref<64x1xf32, #tpu.memory_space<vmem>>, vector<64x1xf32>
    %cst_18 = arith.constant 0.000000e+00 : f32
    %48 = vector.broadcast %cst_18 : f32 to vector<64x1xf32>
    %49 = arith.select %46, %44, %48 : vector<64x1xi1>, vector<64x1xf32>
    %50 = arith.addf %47, %49 : vector<64x1xf32>
    %c0_19 = arith.constant 0 : index
    %c0_20 = arith.constant 0 : index
    %51 = vector.load %arg7[%c0_19, %c0_20] : memref<64x1xf32, #tpu.memory_space<vmem>>, vector<64x1xf32>
    tpu.vector_store %arg7[%c0_19, %c0_20], %50 {strides = array<i32>} : memref<64x1xf32, #tpu.memory_space<vmem>>, vector<64x1xf32>,
    %c0_21 = arith.constant 0 : index
    %c0_22 = arith.constant 0 : index
    %52 = vector.load %arg8[%c0_21, %c0_22] : memref<64x1xf32, #tpu.memory_space<vmem>>, vector<64x1xf32>
    %cst_23 = arith.constant 0.000000e+00 : f32
    %53 = vector.broadcast %cst_23 : f32 to vector<64x1xf32>
    %54 = arith.select %46, %26, %53 : vector<64x1xi1>, vector<64x1xf32>
    %55 = arith.addf %52, %54 : vector<64x1xf32>
    %c0_24 = arith.constant 0 : index
    %c0_25 = arith.constant 0 : index
    %56 = vector.load %arg8[%c0_24, %c0_25] : memref<64x1xf32, #tpu.memory_space<vmem>>, vector<64x1xf32>
    tpu.vector_store %arg8[%c0_24, %c0_25], %55 {strides = array<i32>} : memref<64x1xf32, #tpu.memory_space<vmem>>, vector<64x1xf32>,
    %c2_i32 = arith.constant 2 : i32
    %57 = arith.cmpi eq, %arg1, %c2_i32 : i32
    %58 = arith.extui %57 : i1 to i32
    %c0_i32_26 = arith.constant 0 : i32
    %59 = arith.cmpi ne, %58, %c0_i32_26 : i32
    scf.if %59 {
      %c0_27 = arith.constant 0 : index
      %c0_28 = arith.constant 0 : index
      %60 = vector.load %arg7[%c0_27, %c0_28] : memref<64x1xf32, #tpu.memory_space<vmem>>, vector<64x1xf32>
      %61 = vector.shape_cast %60 : vector<64x1xf32> to vector<1x64x1xf32>
      %cst_29 = arith.constant dense<0.000000e+00> : vector<1xf32>
      %62 = vector.multi_reduction <add>, %61, %cst_29 [1, 2] : vector<1x64x1xf32> to vector<1xf32>
      %63 = vector.shape_cast %62 : vector<1xf32> to vector<1x1x1xf32>
      %64 = vector.extract %63[0, 0, 0] : f32 from vector<1x1x1xf32>
      %65 = vector.broadcast %64 : f32 to vector<1x1xf32>
      %c0_30 = arith.constant 0 : index
      %c0_31 = arith.constant 0 : index
      %c0_32 = arith.constant 0 : index
      %66 = vector.load %arg5[%c0_30, %c0_31, %c0_32] : memref<1x1x1xf32, #tpu.memory_space<vmem>>, vector<1x1x1xf32>
      %67 = vector.shape_cast %66 : vector<1x1x1xf32> to vector<1x1xf32>
      %68 = vector.shape_cast %65 : vector<1x1xf32> to vector<1x1x1xf32>
      tpu.vector_store %arg5[%c0_30, %c0_31, %c0_32], %68 {strides = array<i32>} : memref<1x1x1xf32, #tpu.memory_space<vmem>>, vector<1x1x1xf32>,
      %c0_33 = arith.constant 0 : index
      %c0_34 = arith.constant 0 : index
      %69 = vector.load %arg8[%c0_33, %c0_34] : memref<64x1xf32, #tpu.memory_space<vmem>>, vector<64x1xf32>
      %70 = vector.shape_cast %69 : vector<64x1xf32> to vector<1x64x1xf32>
      %cst_35 = arith.constant dense<0.000000e+00> : vector<1xf32>
      %71 = vector.multi_reduction <add>, %70, %cst_35 [1, 2] : vector<1x64x1xf32> to vector<1xf32>
      %72 = vector.shape_cast %71 : vector<1xf32> to vector<1x1x1xf32>
      %73 = vector.extract %72[0, 0, 0] : f32 from vector<1x1x1xf32>
      %74 = vector.broadcast %73 : f32 to vector<1x1xf32>
      %c0_36 = arith.constant 0 : index
      %c0_37 = arith.constant 0 : index
      %c0_38 = arith.constant 0 : index
      %75 = vector.load %arg6[%c0_36, %c0_37, %c0_38] : memref<1x1x1xf32, #tpu.memory_space<vmem>>, vector<1x1x1xf32>
      %76 = vector.shape_cast %75 : vector<1x1x1xf32> to vector<1x1xf32>
      %77 = vector.shape_cast %74 : vector<1x1xf32> to vector<1x1x1xf32>
      tpu.vector_store %arg6[%c0_36, %c0_37, %c0_38], %77 {strides = array<i32>} : memref<1x1x1xf32, #tpu.memory_space<vmem>>, vector<1x1x1xf32>,
    } else {
    }
    return
  }
  func.func @transform_0(%arg0: i32, %arg1: i32) -> (i32, i32) {
    %c3_i32 = arith.constant 3 : i32
    %0 = arith.muli %arg0, %c3_i32 : i32
    %1 = arith.addi %0, %arg1 : i32
    %c4_i32 = arith.constant 4 : i32
    %2 = arith.minsi %1, %c4_i32 : i32
    %c0_i32 = arith.constant 0 : i32
    %c0_i32_0 = arith.constant 0 : i32
    return %2, %c0_i32 : i32, i32
  }
  func.func @transform_1(%arg0: i32, %arg1: i32) -> (i32, i32) {
    %c3_i32 = arith.constant 3 : i32
    %0 = arith.muli %arg0, %c3_i32 : i32
    %1 = arith.addi %0, %arg1 : i32
    %c0_i32 = arith.constant 0 : i32
    %c0_i32_0 = arith.constant 0 : i32
    return %1, %c0_i32 : i32, i32
  }
  func.func @transform_2(%arg0: i32, %arg1: i32) -> (i32, i32) {
    %c0_i32 = arith.constant 0 : i32
    %c0_i32_0 = arith.constant 0 : i32
    %c0_i32_1 = arith.constant 0 : i32
    return %c0_i32, %c0_i32_0 : i32, i32
  }
  func.func @transform_3(%arg0: i32, %arg1: i32) -> (i32, i32, i32) {
    %c0_i32 = arith.constant 0 : i32
    %c0_i32_0 = arith.constant 0 : i32
    %c0_i32_1 = arith.constant 0 : i32
    return %arg0, %c0_i32, %c0_i32_0 : i32, i32, i32
  }
  func.func @transform_4(%arg0: i32, %arg1: i32) -> (i32, i32, i32) {
    %c0_i32 = arith.constant 0 : i32
    %c0_i32_0 = arith.constant 0 : i32
    %c0_i32_1 = arith.constant 0 : i32
    return %arg0, %c0_i32, %c0_i32_0 : i32, i32, i32
  }
}

</mosaic_0001>

<bundles_post_ra>
// kernel: tpu_custom_call.1
= control target key start
LH: loop header
LB: loop body
LE: loop exit
PB: predicated region body
PF: predicated region fallthrough
CT: control target
= control target key end

     0   :  { %s1063_s15 = smov 0   ;;  %s1065_s16 = smov 0   ;;  %s1483_s0 = inlined_call_operand.vmem [shape: f32[300,8], index: 0, kind: input, shape index: {}]   ;;  %s1484_s1 = inlined_call_operand.vmem [shape: s32[384,1], index: 1, kind: input, shape index: {}]   ;;  %s1485_s2 = inlined_call_operand.vmem [shape: f32[1,8], index: 2, kind: input, shape index: {}]   ;;  %s1486_s3 = inlined_call_operand.vmem [shape: f32[2,1,1], index: 3, kind: output, shape index: {0}]   ;;  %s1487_s4 = inlined_call_operand.vmem [shape: f32[2,1,1], index: 4, kind: output, shape index: {1}]  }
   0x1   :  { %s1067_s17 = smov 0   ;;  %s1069_s18 = smov 0  }
   0x2   :  { %s1071_s19 = smov 0  }
   0x3 LB: > { %s24_s20 = sadd.s32 1, %s1025_s17  ;;  %s27_s21 = sadd.s32 1, %s1029_s18  ;;  %s1033_s19 = sphi %s1071_s19, %s15_s19   ;;  %s1029_s18 = sphi %s1069_s18, %s1491_s18   ;;  %s1025_s17 = sphi %s1067_s17, %s1490_s17   ;;  %s1021_s16 = sphi %s1065_s16, %s1489_s16   ;;  %s1017_s15 = sphi %s1063_s15, %s1488_s15  }
   0x4   : > { %p25_p0 = scmp.ge.s32.totalorder %s24_s20, 3  ;;  %p897_p1 = scmp.ge.s32.totalorder %s1033_s19, 1 }
   0x5   : > { %p221_p2 = scmp.lt.s32.totalorder %s1033_s19, 7 }
   0x6   : > { %s1493_s20 = smov (%p25_p0, %s24_s20), 0  ;;  %s1495_s21 = smov (!%p25_p0, %s27_s21), %s1029_s18 }
   0x7   : > { %p222_p3 = pnand %p897_p1, %p221_p2  ;;  %p29_p4 = scmp.ge.s32.totalorder %s1495_s21, 2 }
   0x8   : > { %s263_s22 = smul.u32 (!%p222_p3), 3, %s1021_s16  ;;  %p295_p7 = scmp.lt.s32.totalorder (!%p222_p3), %s1021_s16, 1 }
   0x9   : > { %s1497_s21 = smov (%p29_p4, %s1495_s21), 0  ;;  %225 = sbr.rel (%p222_p3) target bundleno = 637 (0x27d), region = 32 }
   0xa   : > { %s264_s23 = sadd.s32 (!%p222_p3), %s1017_s15, %s263_s22  ;;  %p902_p9 = scmp.ne.s32.totalorder (!%p222_p3), %s1017_s15, 0 }
   0xb   : > { %p265_p5 = scmp.lt.s32.totalorder (!%p222_p3), %s264_s23, 4  ;;  %s900_s24 = sshll.u32 (!%p222_p3), %s264_s23, 3 }
   0xc   : > { %p288_p6 = scmp.lt.s32.totalorder (!%p222_p3), %s900_s24, 47 }
  0x10   : > { %s1499_s23 = smov (!%p265_p5, %s264_s23), 4  ;;  %s1501_s24 = smov (!%p288_p6, %s900_s24), 47 }
  0x11   : > { %s898_s25 = sshll.u32 %s1499_s23, 3  ;;  %s901_s26 = sshll.u32 %s1501_s24, 3  ;;  %vm305_vm0 = vcmask (!%p902_p9), 7168   ;;  %v1035_v0 = vmov (!%p902_p9), 0.0  }
  0x12   : > { %p272_p8 = scmp.lt.s32.totalorder %s898_s25, 37  ;;  %s1099_s29 = scalar_lea.vmem %s1484_s1, %s901_s26  ;;  %306 = vst.msk [vmem:[#allocation2] sm:$0xff] (!%p902_p9), %vm305_vm0, %v1035_v0  ;;  %307 = vst.msk [vmem:[#allocation2 + $0x8] sm:$0xff] (!%p902_p9), %vm305_vm0, %v1035_v0 }
  0x13   : > { %s1505_s16 = smov (!%p295_p7, %s1021_s16), 1  ;;  %304 = sbr.rel (%p902_p9) target bundleno = 27 (0x1b), region = 36 }
  0x14   : > { %s1503_s25 = smov (!%p272_p8, %s898_s25), 37  ;;  %s297_s10 = scalar_lea.vmem %s1486_s3, %s1505_s16  ;;  %308 = vst.msk [vmem:[#allocation2 + $0x10] sm:$0xff] (!%p902_p9), %vm305_vm0, %v1035_v0  ;;  %309 = vst.msk [vmem:[#allocation2 + $0x18] sm:$0xff] (!%p902_p9), %vm305_vm0, %v1035_v0 }
  0x15   : > { %s899_s30 = sshll.u32 %s1503_s25, 3  ;;  %s300_s13 = scalar_lea.vmem %s1487_s4, %s1505_s16  ;;  %310 = vst.msk [vmem:[#allocation2 + $0x20] sm:$0xff] (!%p902_p9), %vm305_vm0, %v1035_v0  ;;  %311 = vst.msk [vmem:[#allocation2 + $0x28] sm:$0xff] (!%p902_p9), %vm305_vm0, %v1035_v0 }
  0x16   : > { %s1106_s7 = scalar_lea.vmem %s1483_s0, %s899_s30  ;;  %312 = vst.msk [vmem:[#allocation2 + $0x30] sm:$0xff] (!%p902_p9), %vm305_vm0, %v1035_v0  ;;  %313 = vst.msk [vmem:[#allocation2 + $0x38] sm:$0xff] (!%p902_p9), %vm305_vm0, %v1035_v0 }
  0x17   : > { %314 = vst.msk [vmem:[#allocation3] sm:$0xff] (!%p902_p9), %vm305_vm0, %v1035_v0  ;;  %315 = vst.msk [vmem:[#allocation3 + $0x8] sm:$0xff] (!%p902_p9), %vm305_vm0, %v1035_v0 }
  0x18   : > { %316 = vst.msk [vmem:[#allocation3 + $0x10] sm:$0xff] (!%p902_p9), %vm305_vm0, %v1035_v0  ;;  %317 = vst.msk [vmem:[#allocation3 + $0x18] sm:$0xff] (!%p902_p9), %vm305_vm0, %v1035_v0 }
  0x19   : > { %318 = vst.msk [vmem:[#allocation3 + $0x20] sm:$0xff] (!%p902_p9), %vm305_vm0, %v1035_v0  ;;  %319 = vst.msk [vmem:[#allocation3 + $0x28] sm:$0xff] (!%p902_p9), %vm305_vm0, %v1035_v0 }
  0x1a   : > { %320 = vst.msk [vmem:[#allocation3 + $0x30] sm:$0xff] %vm305_vm0, %v1035_v0  ;;  %321 = vst.msk [vmem:[#allocation3 + $0x38] sm:$0xff] %vm305_vm0, %v1035_v0 }
  0x1b PF: > { %v1134_v1 = vld [vmem:[%s1106_s7 + $0x10] sm:$0xff]  ;;  %vm339_vm1 = vcmask 64512   ;;  %v1137_v2 = vld [vmem:[%s1106_s7] sm:$0xff]  ;;  %v1140_v3 = vld [vmem:[%s1106_s7 + $0x18] sm:$0xff]  ;;  %v1036_v7 = vmov 0   ;;  %vm588_vm2 = vcmask 57344   ;;  %v436_v34 = vlaneseq }
  0x1c   : > { %v346_v4 = vsel %vm339_vm1, %v1134_v1, -inf  ;;  %v340_v5 = vsel %vm339_vm1, %v1137_v2, -inf  ;;  %v1147_v6 = vld [vmem:[%s1106_s7 + $0x8] sm:$0xff]  ;;  %962 = vset.pattern.permute.xlu1 %v1036_v7  ;;  %961 = vset.pattern.permute.xlu0 %v1036_v7  ;;  %v349_v8 = vsel %vm339_vm1, %v1140_v3, -inf  ;;  %v1157_v11 = vld [vmem:[%s1106_s7 + $0x20] sm:$0xff]  ;;  %v1164_v14 = vld [vmem:[%s1106_s7 + $0x38] sm:$0xff] }
  0x1d   : > { %347 = vmax.xlane.f32.xlu1 %v346_v4  ;;  %341 = vmax.xlane.f32.xlu0 %v340_v5  ;;  %v343_v9 = vsel %vm339_vm1, %v1147_v6, -inf  ;;  %v1154_v10 = vld [vmem:[%s1106_s7 + $0x28] sm:$0xff]  ;;  %v352_v13 = vsel %vm339_vm1, %v1157_v11, -inf  ;;  %v1167_v15 = vld [vmem:[%s1106_s7 + $0x30] sm:$0xff]  ;;  %v361_v16 = vsel %vm339_vm1, %v1164_v14, -inf  ;;  %v1181_v20 = vld [vmem:[%s1099_s29] sm:$0xff] }
  0x1e   : > { %v355_v12 = vsel %vm339_vm1, %v1154_v10, -inf  ;;  %v358_v17 = vsel %vm339_vm1, %v1167_v15, -inf  ;;  %v1174_v18 = vld [vmem:[%s1099_s29 + $0x8] sm:$0xff]  ;;  %v1178_v19 = vld [vmem:[%s1099_s29 + $0x10] sm:$0xff]  ;;  %v1186_v21 = vld [vmem:[%s1099_s29 + $0x18] sm:$0xff]  ;;  %v437_v36 = vand.u32 127, %v436_v34 }
  0x1f   : > { %v1190_v22 = vld [vmem:[%s1099_s29 + $0x20] sm:$0xff]  ;;  %v1194_v23 = vld [vmem:[%s1099_s29 + $0x28] sm:$0xff]  ;;  %v1198_v24 = vld [vmem:[%s1099_s29 + $0x30] sm:$0xff]  ;;  %v1037_v39 = vmov 0.0   ;;  %v1232_v57 = vshrl.u32 %v436_v34, 7  ;;  %vm652_vm11 = vcmp.ne.s32.totalorder %v1181_v20, 0 }
  0x20   : > { %v1202_v25 = vld [vmem:[%s1099_s29 + $0x38] sm:$0xff]  ;;  %v338_v26 = vld [vmem:[%s1485_s2] sm:$0x1]  ;;  %vm684_vm12 = vcmask 7168   ;;  %vm654_vm13 = vcmp.ne.s32.totalorder %v1178_v19, 0  ;;  %vm653_vm14 = vcmp.ne.s32.totalorder %v1174_v18, 0 }
  0x21   : > { %350 = vmax.xlane.f32.xlu1 %v349_v8  ;;  %344 = vmax.xlane.f32.xlu0 %v343_v9  ;;  %v589_v27 = vsel %vm588_vm2, %v338_v26, 0.0  ;;  %v521_v62 = vsub.s32 0, %v1232_v57  ;;  %vm656_vm15 = vcmp.ne.s32.totalorder %v1190_v22, 0  ;;  %vm655_vm0 = vcmp.ne.s32.totalorder %v1186_v21, 0  ;;  %p911_p10 = scmp.ne.s32.totalorder %s1017_s15, 2 }
  0x22   : > { %vm658_vm2 = vcmp.ne.s32.totalorder %v1198_v24, 0 }
  0x23   : > { %v1247_v9 = vrot.slane %v338_v26, %v521_v62 }
  0x25   : > { %356 = vmax.xlane.f32.xlu1 %v355_v12  ;;  %353 = vmax.xlane.f32.xlu0 %v352_v13 }
  0x29   : > { %362 = vmax.xlane.f32.xlu1 %v361_v16  ;;  %359 = vmax.xlane.f32.xlu0 %v358_v17 }
  0x3a   : > { %442 = vperm.xlu1 %962, %v1174_v18  }
  0x3e   : > { %445 = vperm.xlu1 %962, %v1178_v19  }
  0x3f   : > { %439 = vperm.xlu0 %961, %v1181_v20  }
  0x42   : > { %448 = vperm.xlu1 %962, %v1186_v21  }
  0x46   : > { %451 = vperm.xlu1 %962, %v1190_v22  }
  0x4a   : > { %454 = vperm.xlu1 %962, %v1194_v23  }
  0x4e   : > { %457 = vperm.xlu1 %962, %v1198_v24  }
  0x52   : > { %460 = vperm.xlu1 %962, %v1202_v25  }
  0x5e   : > { %590 = vadd.xlane.f32.xlu0 %v589_v27 }
  0xaa   : > { %v1208_v28 = vpop.xlane.xlu1 %347  ;;  %v1210_v29 = vpop.xlane.xlu0 %341 }
  0xab   : > { %v364_v0 = vsub.f32 %v1137_v2, %v1210_v29  ;;  %v366_v26 = vsub.f32 %v1134_v1, %v1208_v28 }
  0xad   : > { %v372_v13 = vmul.f32 1.442695, %v364_v0 }
  0xae   : > { %v1212_v30 = vpop.xlane.xlu1 %350  ;;  %v1214_v31 = vpop.xlane.xlu0 %344 }
  0xaf   : > { %v367_v8 = vsub.f32 %v1140_v3, %v1212_v30  ;;  %v365_v16 = vsub.f32 %v1147_v6, %v1214_v31  ;;  %963 = vpow2.f32 %v372_v13 }
  0xb2   : > { %v1216_v32 = vpop.xlane.xlu1 %356  ;;  %v1218_v33 = vpop.xlane.xlu0 %353 }
  0xb6   : > { %v1220_v35 = vpop.xlane.xlu1 %362  ;;  %v1222_v37 = vpop.xlane.xlu0 %359 }
  0xba   : > { %v443_v38 = vpop.permute.xlu1 %442 }
  0xbb   : > { %vm463_vm3 = vcmp.eq.s32.totalorder %v437_v36, %v443_v38 }
  0xbc   : > { %v904_v40 = vsel %vm463_vm3, 1.0, %v1037_v39  ;;  %vm659_vm3 = vcmp.ne.s32.totalorder %v1202_v25, 0 }
  0xbd   : > { %v487_v41 = vmul.f32 %v904_v40, %v1147_v6 }
  0xbe   : > { %v446_v42 = vpop.permute.xlu1 %445  ;;  %v440_v43 = vpop.permute.xlu0 %439 }
  0xbf   : > { %vm464_vm4 = vcmp.eq.s32.totalorder %v437_v36, %v446_v42  ;;  %vm462_vm5 = vcmp.eq.s32.totalorder %v437_v36, %v440_v43  ;;  %v497_v44 = vsel %vm339_vm1, %v487_v41, 0.0  ;;  %v378_v41 = vmul.f32 1.442695, %v367_v8 }
  0xc0   : > { %v905_v45 = vsel %vm464_vm4, 1.0, %v1037_v39  ;;  %v903_v46 = vsel %vm462_vm5, 1.0, %v1037_v39  ;;  %498 = vadd.xlane.f32.xlu0 %v497_v44  ;;  %v369_v43 = vsub.f32 %v1154_v10, %v1216_v32  ;;  %v374_v44 = vmul.f32 1.442695, %v365_v16 }
  0xc1   : > { %v486_v47 = vmul.f32 %v903_v46, %v1137_v2  ;;  %v488_v50 = vmul.f32 %v905_v45, %v1134_v1  ;;  %v524_v34 = vmul.f32 %v903_v46, %v1247_v9  ;;  %v526_v46 = vmul.f32 %v905_v45, %v1247_v9 }
  0xc2   : > { %v449_v48 = vpop.permute.xlu1 %448  ;;  %965 = vpow2.f32 %v378_v41  ;;  %vm762_vm4 = vcmask (!%p911_p10), 0  }
  0xc3   : > { %vm465_vm6 = vcmp.eq.s32.totalorder %v437_v36, %v449_v48  ;;  %v494_v49 = vsel %vm339_vm1, %v486_v47, 0.0  ;;  %v500_v55 = vsel %vm339_vm1, %v488_v50, 0.0  ;;  %v532_v47 = vsel %vm339_vm1, %v524_v34, 0.0 }
  0xc4   : > { %v906_v51 = vsel %vm465_vm6, 1.0, %v1037_v39  ;;  %495 = vadd.xlane.f32.xlu1 %v494_v49  ;;  %v376_v48 = vmul.f32 1.442695, %v366_v26  ;;  %v368_v49 = vsub.f32 %v1157_v11, %v1218_v33  ;;  %v382_v50 = vmul.f32 1.442695, %v369_v43 }
  0xc5   : > { %v489_v52 = vmul.f32 %v906_v51, %v1140_v3  ;;  %967 = vpow2.f32 %v374_v44 }
  0xc6   : > { %v452_v53 = vpop.permute.xlu1 %451  ;;  %969 = vpow2.f32 %v376_v48 }
  0xc7   : > { %vm466_vm7 = vcmp.eq.s32.totalorder %v437_v36, %v452_v53  ;;  %v503_v54 = vsel %vm339_vm1, %v489_v52, 0.0  ;;  %v371_v52 = vsub.f32 %v1164_v14, %v1220_v35  ;;  %971 = vpow2.f32 %v382_v50 }
  0xc8   : > { %v907_v56 = vsel %vm466_vm7, 1.0, %v1037_v39  ;;  %504 = vadd.xlane.f32.xlu0 %v503_v54  ;;  %501 = vadd.xlane.f32.xlu1 %v500_v55  ;;  %v538_v54 = vsel %vm339_vm1, %v526_v46, 0.0  ;;  %v380_v55 = vmul.f32 1.442695, %v368_v49  ;;  %v558_v50 = vmul.f32 %v1247_v9, %v1134_v1 }
  0xc9   : > { %v490_v58 = vmul.f32 %v907_v56, %v1157_v11  ;;  %v528_v45 = vmul.f32 %v907_v56, %v1247_v9 }
  0xca   : > { %v455_v59 = vpop.permute.xlu1 %454  ;;  %973 = vpow2.f32 %v380_v55 }
  0xcb   : > { %vm467_vm8 = vcmp.eq.s32.totalorder %v437_v36, %v455_v59  ;;  %v506_v60 = vsel %vm339_vm1, %v490_v58, 0.0  ;;  %v386_v58 = vmul.f32 1.442695, %v371_v52  ;;  %v370_v59 = vsub.f32 %v1167_v15, %v1222_v37 }
  0xcc   : > { %v908_v61 = vsel %vm467_vm8, 1.0, %v1037_v39  ;;  %507 = vadd.xlane.f32.xlu1 %v506_v60 }
  0xcd   : > { %v491_v63 = vmul.f32 %v908_v61, %v1154_v10  ;;  %v529_v0 = vmul.f32 %v908_v61, %v1247_v9  ;;  %975 = vpow2.f32 %v386_v58 }
  0xce   : > { %v458_v4 = vpop.permute.xlu1 %457 }
  0xcf   : > { %vm468_vm9 = vcmp.eq.s32.totalorder %v437_v36, %v458_v4  ;;  %v509_v5 = vsel %vm339_vm1, %v491_v63, 0.0  ;;  %v544_v63 = vsel %vm339_vm1, %v528_v45, 0.0  ;;  %v964_v4 = vpop.eup %963  ;;  %v562_v45 = vmul.f32 %v1247_v9, %v1167_v15 }
  0xd0   : > { %v1241_v7 = vsel %vm468_vm9, 1.0, %v1037_v39  ;;  %510 = vadd.xlane.f32.xlu0 %v509_v5  ;;  %v966_v56 = vpop.eup %965  ;;  %v547_v5 = vsel %vm339_vm1, %v529_v0, 0.0  ;;  %v388_v8 = vsel %vm339_vm1, %v964_v4, 0.0 }
  0xd1   : > { %v492_v12 = vmul.f32 %v1241_v7, %v1167_v15  ;;  %v397_v61 = vsel %vm339_vm1, %v966_v56, 0.0  ;;  %v530_v44 = vmul.f32 %v1241_v7, %v1247_v9  ;;  %v557_v7 = vmul.f32 %v1247_v9, %v1147_v6 }
  0xd2   : > { %v461_v17 = vpop.permute.xlu1 %460 }
  0xd3   : > { %vm469_vm10 = vcmp.eq.s32.totalorder %v437_v36, %v461_v17  ;;  %v512_v27 = vsel %vm339_vm1, %v492_v12, 0.0  ;;  %v968_v12 = vpop.eup %967  ;;  %v550_v46 = vsel %vm339_vm1, %v530_v44, 0.0 }
  0xd4   : > { %v1255_v38 = vsel %vm469_vm10, 1.0, %v1037_v39  ;;  %513 = vadd.xlane.f32.xlu1 %v512_v27  ;;  %v525_v39 = vmul.f32 %v904_v40, %v1247_v9  ;;  %v527_v40 = vmul.f32 %v906_v51, %v1247_v9  ;;  %v384_v51 = vmul.f32 1.442695, %v370_v59  ;;  %v970_v13 = vpop.eup %969 }
  0xd5   : > { %v493_v42 = vmul.f32 %v1255_v38, %v1164_v14  ;;  %v391_v16 = vsel %vm339_vm1, %v968_v12, 0.0  ;;  %v972_v17 = vpop.eup %971  ;;  %v394_v34 = vsel %vm339_vm1, %v970_v13, 0.0  ;;  %v531_v48 = vmul.f32 %v1255_v38, %v1247_v9  ;;  %v695_v12 = vld [vmem:[#allocation3 + $0x10] sm:$0xff]  ;;  %v694_v13 = vld [vmem:[#allocation3 + $0x8] sm:$0xff] }
  0xd6   : > { %v535_v53 = vsel %vm339_vm1, %v525_v39, 0.0  ;;  %v541_v60 = vsel %vm339_vm1, %v527_v40, 0.0  ;;  %977 = vpow2.f32 %v384_v51  ;;  %v974_v27 = vpop.eup %973  ;;  %v403_v26 = vsel %vm339_vm1, %v972_v17, 0.0 }
  0xd7   : > { %v515_v36 = vsel %vm339_vm1, %v493_v42, 0.0  ;;  %v976_v41 = vpop.eup %975  ;;  %v400_v42 = vsel %vm339_vm1, %v974_v27, 0.0  ;;  %v553_v52 = vsel %vm339_vm1, %v531_v48, 0.0  ;;  %v559_v38 = vmul.f32 %v1247_v9, %v1140_v3  ;;  %v698_v48 = vld [vmem:[#allocation3 + $0x28] sm:$0xff] }
  0xd8   : > { %516 = vadd.xlane.f32.xlu0 %v515_v36  ;;  %533 = vadd.xlane.f32.xlu1 %v532_v47  ;;  %v409_v43 = vsel %vm339_vm1, %v976_v41, 0.0  ;;  %v556_v47 = vmul.f32 %v1247_v9, %v1137_v2  ;;  %v567_v2 = vsel %vm339_vm1, %v557_v7, 0.0  ;;  %v561_v40 = vmul.f32 %v1247_v9, %v1154_v10  ;;  %v697_v41 = vld [vmem:[#allocation3 + $0x20] sm:$0xff] }
  0xd9   : > { %v573_v6 = vsel %vm339_vm1, %v559_v38, 0.0  ;;  %v582_v3 = vsel %vm339_vm1, %v562_v45, 0.0 }
  0xda   : > { %v564_v49 = vsel %vm339_vm1, %v556_v47, 0.0  ;;  %v579_v55 = vsel %vm339_vm1, %v561_v40, 0.0 }
  0xdc   : > { %536 = vadd.xlane.f32.xlu0 %v535_v53  ;;  %539 = vadd.xlane.f32.xlu1 %v538_v54  ;;  %v570_v53 = vsel %vm339_vm1, %v558_v50, 0.0  ;;  %v560_v54 = vmul.f32 %v1247_v9, %v1157_v11  ;;  %v563_v11 = vmul.f32 %v1247_v9, %v1164_v14  ;;  %v693_v9 = vld [vmem:[#allocation3] sm:$0xff] }
  0xde   : > { %v576_v1 = vsel %vm339_vm1, %v560_v54, 0.0  ;;  %v585_v58 = vsel %vm339_vm1, %v563_v11, 0.0 }
  0xe0   : > { %542 = vadd.xlane.f32.xlu0 %v541_v60  ;;  %545 = vadd.xlane.f32.xlu1 %v544_v63  ;;  %v978_v36 = vpop.eup %977 }
  0xe1   : > { %v406_v39 = vsel %vm339_vm1, %v978_v36, 0.0  ;;  %vm657_vm1 = vcmp.ne.s32.totalorder %v1194_v23, 0 }
  0xe4   : > { %548 = vadd.xlane.f32.xlu0 %v547_v5  ;;  %389 = vadd.xlane.f32.xlu1 %v388_v8 }
  0xe8   : > { %392 = vadd.xlane.f32.xlu0 %v391_v16  ;;  %398 = vadd.xlane.f32.xlu1 %v397_v61 }
  0xeb   : > { %v1321_v10 = vpop.xlane.xlu0 %590 }
  0xec   : > { %395 = vadd.xlane.f32.xlu0 %v394_v34  ;;  %404 = vadd.xlane.f32.xlu1 %v403_v26 }
  0xf0   : > { %401 = vadd.xlane.f32.xlu0 %v400_v42  ;;  %410 = vadd.xlane.f32.xlu1 %v409_v43  ;;  %v696_v42 = vld [vmem:[#allocation3 + $0x18] sm:$0xff] }
  0xf4   : > { %407 = vadd.xlane.f32.xlu0 %v406_v39  ;;  %551 = vadd.xlane.f32.xlu1 %v550_v46 }
  0xf8   : > { %554 = vadd.xlane.f32.xlu0 %v553_v52  ;;  %565 = vadd.xlane.f32.xlu1 %v564_v49 }
  0xfc   : > { %568 = vadd.xlane.f32.xlu0 %v567_v2  ;;  %571 = vadd.xlane.f32.xlu1 %v570_v53 }
 0x100   : > { %574 = vadd.xlane.f32.xlu0 %v573_v6  ;;  %577 = vadd.xlane.f32.xlu1 %v576_v1 }
 0x104   : > { %580 = vadd.xlane.f32.xlu0 %v579_v55  ;;  %583 = vadd.xlane.f32.xlu1 %v582_v3  ;;  %v699_v3 = vld [vmem:[#allocation3 + $0x30] sm:$0xff] }
 0x108   : > { %586 = vadd.xlane.f32.xlu0 %v585_v58 }
 0x14d   : > { %v1325_v15 = vpop.xlane.xlu0 %498 }
 0x151   : > { %v1319_v59 = vpop.xlane.xlu1 %495 }
 0x155   : > { %v1323_v60 = vpop.xlane.xlu1 %501  ;;  %v1327_v63 = vpop.xlane.xlu0 %504 }
 0x159   : > { %v1329_v0 = vpop.xlane.xlu1 %507 }
 0x15d   : > { %v1331_v4 = vpop.xlane.xlu0 %510 }
 0x161   : > { %v1333_v14 = vpop.xlane.xlu1 %513 }
 0x165   : > { %v1336_v51 = vpop.xlane.xlu1 %533  ;;  %v1338_v56 = vpop.xlane.xlu0 %516 }
 0x166   : > { %v701_v5 = vsel %vm652_vm11, %v1336_v51, 0.0 }
 0x167   : > { %v709_v8 = vadd.f32 %v701_v5, %v693_v9 }
 0x169   : > { %717 = vst.msk [vmem:[#allocation3] sm:$0xff] %vm684_vm12, %v709_v8  ;;  %v1346_v16 = vpop.xlane.xlu1 %539  ;;  %v1348_v61 = vpop.xlane.xlu0 %536 }
 0x16a   : > { %v703_v17 = vsel %vm654_vm13, %v1346_v16, 0.0  ;;  %v702_v27 = vsel %vm653_vm14, %v1348_v61, 0.0 }
 0x16b   : > { %v711_v34 = vadd.f32 %v703_v17, %v695_v12  ;;  %v710_v26 = vadd.f32 %v702_v27, %v694_v13  ;;  %v1375_v12 = vrot.slane %v1321_v10, %v521_v62 }
 0x16d   : > { %719 = vst.msk [vmem:[#allocation3 + $0x10] sm:$0xff] %vm684_vm12, %v711_v34  ;;  %718 = vst.msk [vmem:[#allocation3 + $0x8] sm:$0xff] %vm684_vm12, %v710_v26  ;;  %v546_v43 = vpop.xlane.xlu1 %545  ;;  %v543_v44 = vpop.xlane.xlu0 %542  ;;  %v620_v26 = vmul.f32 0.9, %v1336_v51 }
 0x16e   : > { %v705_v36 = vsel %vm656_vm15, %v546_v43, 0.0  ;;  %v704_v47 = vsel %vm655_vm0, %v543_v44, 0.0 }
 0x16f   : > { %v713_v39 = vadd.f32 %v705_v36, %v697_v41  ;;  %v712_v46 = vadd.f32 %v704_v47, %v696_v42  ;;  %v700_v42 = vld [vmem:[#allocation3 + $0x38] sm:$0xff]  ;;  %v622_v36 = vmul.f32 0.9, %v1346_v16  ;;  %v621_v47 = vmul.f32 0.9, %v1348_v61 }
 0x170   : > { %v764_v25 = vld [vmem:[#allocation3] sm:$0xff] (!%p911_p10) }
 0x171   : > { %721 = vst.msk [vmem:[#allocation3 + $0x20] sm:$0xff] %vm684_vm12, %v713_v39  ;;  %720 = vst.msk [vmem:[#allocation3 + $0x18] sm:$0xff] %vm684_vm12, %v712_v46  ;;  %v390_v49 = vpop.xlane.xlu1 %389  ;;  %v549_v7 = vpop.xlane.xlu0 %548 }
 0x172   : > { %979 = vlog2.f32 %v390_v49  ;;  %v706_v50 = vsel %vm657_vm1, %v549_v7, 0.0 }
 0x173   : > { %v714_v52 = vadd.f32 %v706_v50, %v698_v48  ;;  %v1390_v48 = vmul.f32 0.9, %v546_v43 }
 0x175   : > { %722 = vst.msk [vmem:[#allocation3 + $0x28] sm:$0xff] %vm684_vm12, %v714_v52  ;;  %v399_v2 = vpop.xlane.xlu1 %398  ;;  %v393_v53 = vpop.xlane.xlu0 %392 }
 0x176   : > { %981 = vlog2.f32 %v399_v2 }
 0x177   : > { %983 = vlog2.f32 %v393_v53 }
 0x179   : > { %v405_v38 = vpop.xlane.xlu1 %404  ;;  %v396_v54 = vpop.xlane.xlu0 %395 }
 0x17a   : > { %985 = vlog2.f32 %v405_v38 }
 0x17b   : > { %987 = vlog2.f32 %v396_v54 }
 0x17c   : > { %v980_v6 = vpop.eup %979 }
 0x17d   : > { %v413_v1 = vmul.f32 0.6931472, %v980_v6  ;;  %v411_v40 = vpop.xlane.xlu1 %410  ;;  %v402_v45 = vpop.xlane.xlu0 %401  ;;  %v625_v6 = vmul.f32 0.9, %v549_v7 }
 0x17e   : > { %989 = vlog2.f32 %v411_v40 }
 0x17f   : > { %991 = vlog2.f32 %v402_v45  ;;  %v428_v11 = vadd.f32 %v413_v1, %v1210_v29 }
 0x180   : > { %v982_v55 = vpop.eup %981 }
 0x181   : > { %v984_v58 = vpop.eup %983  ;;  %v419_v9 = vmul.f32 0.6931472, %v982_v55  ;;  %v552_v5 = vpop.xlane.xlu1 %551  ;;  %v592_v41 = vsub.f32 %v428_v11, %v1319_v59  ;;  %v604_v57 = vmul.f32 %v1375_v12, %v428_v11 }
 0x182   : > { %v408_v8 = vpop.xlane.xlu0 %407  ;;  %v415_v13 = vmul.f32 0.6931472, %v984_v58  ;;  %v707_v17 = vsel %vm658_vm2, %v552_v5, 0.0  ;;  %v626_v40 = vmul.f32 0.9, %v552_v5 }
 0x183   : > { %993 = vlog2.f32 %v408_v8  ;;  %v715_v27 = vadd.f32 %v707_v17, %v699_v3  ;;  %v431_v34 = vadd.f32 %v419_v9, %v1212_v30  ;;  %v628_v2 = vmul.f32 %v620_v26, %v592_v41  ;;  %v660_v3 = vld [vmem:[#allocation2] sm:$0xff] }
 0x184   : > { %v986_v29 = vpop.eup %985  ;;  %v429_v62 = vadd.f32 %v415_v13, %v1214_v31  ;;  %v623_v31 = vmul.f32 0.9, %v543_v44 }
 0x185   : > { %v988_v10 = vpop.eup %987  ;;  %v423_v39 = vmul.f32 0.6931472, %v986_v29  ;;  %723 = vst.msk [vmem:[#allocation3 + $0x30] sm:$0xff] %vm684_vm12, %v715_v27  ;;  %v566_v46 = vpop.xlane.xlu1 %565  ;;  %v595_v61 = vsub.f32 %v431_v34, %v1327_v63  ;;  %v607_v58 = vmul.f32 %v1375_v12, %v431_v34 }
 0x186   : > { %v1388_v30 = vpop.xlane.xlu0 %554  ;;  %v417_v51 = vmul.f32 0.6931472, %v988_v10  ;;  %v612_v59 = vsub.f32 %v604_v57, %v566_v46  ;;  %v593_v16 = vsub.f32 %v429_v62, %v1325_v15  ;;  %v605_v38 = vmul.f32 %v1375_v12, %v429_v62 }
 0x187   : > { %v708_v49 = vsel %vm659_vm3, %v1388_v30, 0.0  ;;  %v433_v55 = vadd.f32 %v423_v39, %v1216_v32  ;;  %v631_v7 = vmul.f32 %v623_v31, %v595_v61 }
 0x188   : > { %v716_v50 = vadd.f32 %v708_v49, %v700_v42  ;;  %v990_v52 = vpop.eup %989  ;;  %v636_v53 = vmul.f32 0.0125, %v612_v59  ;;  %v430_v43 = vadd.f32 %v417_v51, %v1208_v28  ;;  %v629_v9 = vmul.f32 %v621_v47, %v593_v16 }
 0x189   : > { %v992_v54 = vpop.eup %991  ;;  %v427_v1 = vmul.f32 0.6931472, %v990_v52  ;;  %v572_v44 = vpop.xlane.xlu1 %571  ;;  %v597_v42 = vsub.f32 %v433_v55, %v1331_v4 }
 0x18a   : > { %724 = vst.msk [vmem:[#allocation3 + $0x38] sm:$0xff] %vm684_vm12, %v716_v50  ;;  %v569_v45 = vpop.xlane.xlu0 %568  ;;  %v421_v15 = vmul.f32 0.6931472, %v992_v54  ;;  %v644_v63 = vadd.f32 %v636_v53, %v628_v2  ;;  %v594_v8 = vsub.f32 %v430_v43, %v1323_v60  ;;  %v606_v28 = vmul.f32 %v1375_v12, %v430_v43  ;;  %v661_v60 = vld [vmem:[#allocation2 + $0x8] sm:$0xff]  ;;  %v662_v50 = vld [vmem:[#allocation2 + $0x10] sm:$0xff]  ;;  %v663_v2 = vld [vmem:[#allocation2 + $0x18] sm:$0xff] }
 0x18b   : > { %v613_v11 = vsub.f32 %v605_v38, %v569_v45  ;;  %v435_v5 = vadd.f32 %v427_v1, %v1220_v35  ;;  %v633_v43 = vmul.f32 %v625_v6, %v597_v42  ;;  %v665_v6 = vld [vmem:[#allocation2 + $0x28] sm:$0xff] }
 0x18c   : > { %v668_v17 = vsel %vm652_vm11, %v644_v63, 0.0  ;;  %v432_v32 = vadd.f32 %v421_v15, %v1218_v33  ;;  %v614_v41 = vsub.f32 %v606_v28, %v572_v44  ;;  %v630_v20 = vmul.f32 %v622_v36, %v594_v8  ;;  %v664_v44 = vld [vmem:[#allocation2 + $0x20] sm:$0xff]  ;;  %v666_v8 = vld [vmem:[#allocation2 + $0x30] sm:$0xff] }
 0x18d   : > { %v994_v13 = vpop.eup %993  ;;  %v637_v27 = vmul.f32 0.0125, %v613_v11  ;;  %v676_v26 = vadd.f32 %v668_v17, %v660_v3  ;;  %v578_v34 = vpop.xlane.xlu1 %577  ;;  %v609_v33 = vmul.f32 %v1375_v12, %v433_v55  ;;  %v599_v51 = vsub.f32 %v435_v5, %v1338_v56  ;;  %v667_v17 = vld [vmem:[#allocation2 + $0x38] sm:$0xff] }
 0x18e   : > { %v425_v29 = vmul.f32 0.6931472, %v994_v13  ;;  %v575_v57 = vpop.xlane.xlu0 %574  ;;  %v596_v47 = vsub.f32 %v432_v32, %v1329_v0  ;;  %v608_v35 = vmul.f32 %v1375_v12, %v432_v32  ;;  %v638_v39 = vmul.f32 0.0125, %v614_v41 }
 0x18f   : > { %v645_v62 = vadd.f32 %v637_v27, %v629_v9  ;;  %v615_v10 = vsub.f32 %v607_v58, %v575_v57  ;;  %685 = vst.msk [vmem:[#allocation2] sm:$0xff] %vm684_vm12, %v676_v26  ;;  %v611_v1 = vmul.f32 %v1375_v12, %v435_v5  ;;  %v627_v58 = vmul.f32 0.9, %v1388_v30 }
 0x190   : > { %v434_v46 = vadd.f32 %v425_v29, %v1222_v37  ;;  %v616_v49 = vsub.f32 %v608_v35, %v578_v34  ;;  %v646_v0 = vadd.f32 %v638_v39, %v630_v20  ;;  %v632_v37 = vmul.f32 %v1390_v48, %v596_v47  ;;  %v765_v47 = vld [vmem:[#allocation3 + $0x8] sm:$0xff] (!%p911_p10)  ;;  %v766_v35 = vld [vmem:[#allocation3 + $0x10] sm:$0xff] (!%p911_p10)  ;;  %v767_v20 = vld [vmem:[#allocation3 + $0x18] sm:$0xff] (!%p911_p10) }
 0x191   : > { %v669_v4 = vsel %vm653_vm14, %v645_v62, 0.0  ;;  %v639_v59 = vmul.f32 0.0125, %v615_v10  ;;  %v584_v61 = vpop.xlane.xlu1 %583  ;;  %v772_v39 = vsel (!%p911_p10), %vm684_vm12, %v764_v25, 0.0 }
 0x192   : > { %v677_v31 = vadd.f32 %v669_v4, %v661_v60  ;;  %v581_v16 = vpop.xlane.xlu0 %580  ;;  %v598_v52 = vsub.f32 %v434_v46, %v1333_v14  ;;  %v610_v36 = vmul.f32 %v1375_v12, %v434_v46  ;;  %v640_v38 = vmul.f32 0.0125, %v616_v49  ;;  %v768_v49 = vld [vmem:[#allocation3 + $0x20] sm:$0xff] (!%p911_p10) }
 0x193   : > { %v647_v53 = vadd.f32 %v639_v59, %v631_v7  ;;  %v617_v56 = vsub.f32 %v609_v33, %v581_v16  ;;  %v670_v18 = vsel %vm654_vm13, %v646_v0, 0.0  ;;  %v635_v7 = vmul.f32 %v627_v58, %v599_v51 }
 0x194   : > { %686 = vst.msk [vmem:[#allocation2 + $0x8] sm:$0xff] %vm684_vm12, %v677_v31  ;;  %v618_v54 = vsub.f32 %v610_v36, %v584_v61  ;;  %v678_v45 = vadd.f32 %v670_v18, %v662_v50  ;;  %v648_v55 = vadd.f32 %v640_v38, %v632_v37  ;;  %v634_v48 = vmul.f32 %v626_v40, %v598_v52  ;;  %v769_v52 = vld [vmem:[#allocation3 + $0x28] sm:$0xff] (!%p911_p10) }
 0x195   : > { %v671_v14 = vsel %vm655_vm0, %v647_v53, 0.0  ;;  %v641_v15 = vmul.f32 0.0125, %v617_v56  ;;  %v773_v51 = vsel (!%p911_p10), %vm684_vm12, %v765_v47, 0.0  ;;  %v775_v4 = vsel (!%p911_p10), %vm684_vm12, %v766_v35, 0.0  ;;  %v770_v56 = vld [vmem:[#allocation3 + $0x30] sm:$0xff] (!%p911_p10) }
 0x196   : > { %v679_v3 = vadd.f32 %v671_v14, %v663_v2  ;;  %v642_v63 = vmul.f32 0.0125, %v618_v54  ;;  %v587_v11 = vpop.xlane.xlu0 %586  ;;  %687 = vst.msk [vmem:[#allocation2 + $0x10] sm:$0xff] %vm684_vm12, %v678_v45  ;;  %v672_v19 = vsel %vm656_vm15, %v648_v55, 0.0  ;;  %v729_v23 = vld [vmem:[#allocation2] sm:$0xff] (!%p911_p10)  ;;  %v774_v31 = vadd.f32 (!%p911_p10), %v773_v51, %v772_v39  ;;  %v771_v45 = vld [vmem:[#allocation3 + $0x38] sm:$0xff] (!%p911_p10) }
 0x197   : > { %v649_v12 = vadd.f32 %v641_v15, %v633_v43  ;;  %v619_v9 = vsub.f32 %v611_v1, %v587_v11  ;;  %v680_v21 = vadd.f32 %v672_v19, %v664_v44  ;;  %v737_v57 = vsel (!%p911_p10), %vm684_vm12, %v729_v23, 0.0 }
 0x198   : > { %688 = vst.msk [vmem:[#allocation2 + $0x18] sm:$0xff] %vm684_vm12, %v679_v3  ;;  %v650_v28 = vadd.f32 %v642_v63, %v634_v48  ;;  %v777_v16 = vsel (!%p911_p10), %vm684_vm12, %v767_v20, 0.0  ;;  %v776_v36 = vadd.f32 (!%p911_p10), %v775_v4, %v774_v31  ;;  %v779_v37 = vsel (!%p911_p10), %vm684_vm12, %v768_v49, 0.0 }
 0x199   : > { %v673_v40 = vsel %vm657_vm1, %v649_v12, 0.0  ;;  %v643_v13 = vmul.f32 0.0125, %v619_v9  ;;  %689 = vst.msk [vmem:[#allocation2 + $0x20] sm:$0xff] %vm684_vm12, %v680_v21  ;;  %v781_v54 = vsel (!%p911_p10), %vm684_vm12, %v769_v52, 0.0  ;;  %v783_v55 = vsel (!%p911_p10), %vm684_vm12, %v770_v56, 0.0 }
 0x19a   : > { %v681_v30 = vadd.f32 %v673_v40, %v665_v6  ;;  %v674_v22 = vsel %vm658_vm2, %v650_v28, 0.0  ;;  %728 = sbr.rel (%p911_p10) target bundleno = 637 (0x27d), region = 40  ;;  %v778_v18 = vadd.f32 (!%p911_p10), %v777_v16, %v776_v36  ;;  %v785_v48 = vsel (!%p911_p10), %vm684_vm12, %v771_v45, 0.0 }
 0x19b   : > { %v682_v5 = vadd.f32 %v674_v22, %v666_v8  ;;  %v651_v27 = vadd.f32 %v643_v13, %v635_v7  ;;  %v730_v26 = vld [vmem:[#allocation2 + $0x8] sm:$0xff] (!%p911_p10) }
 0x19c   : > { %690 = vst.msk [vmem:[#allocation2 + $0x28] sm:$0xff] %vm684_vm12, %v681_v30  ;;  %v738_v34 = vsel (!%p911_p10), %vm684_vm12, %v730_v26, 0.0  ;;  %v780_v14 = vadd.f32 (!%p911_p10), %v779_v37, %v778_v18 }
 0x19d   : > { %691 = vst.msk [vmem:[#allocation2 + $0x30] sm:$0xff] %vm684_vm12, %v682_v5  ;;  %v675_v32 = vsel %vm659_vm3, %v651_v27, 0.0  ;;  %v731_v24 = vld [vmem:[#allocation2 + $0x10] sm:$0xff] (!%p911_p10)  ;;  %v739_v62 = vadd.f32 (!%p911_p10), %v738_v34, %v737_v57 }
 0x19e   : > { %v683_v29 = vadd.f32 %v675_v32, %v667_v17  ;;  %v740_v42 = vsel (!%p911_p10), %vm684_vm12, %v731_v24, 0.0  ;;  %v782_v15 = vadd.f32 (!%p911_p10), %v781_v54, %v780_v14 }
 0x19f   : > { %v732_v41 = vld [vmem:[#allocation2 + $0x18] sm:$0xff] (!%p911_p10)  ;;  %v741_v46 = vadd.f32 (!%p911_p10), %v740_v42, %v739_v62 }
 0x1a0   : > { %692 = vst.msk [vmem:[#allocation2 + $0x38] sm:$0xff] %vm684_vm12, %v683_v29  ;;  %v733_v60 = vld [vmem:[#allocation2 + $0x20] sm:$0xff] (!%p911_p10)  ;;  %v742_v10 = vsel (!%p911_p10), %vm684_vm12, %v732_v41, 0.0  ;;  %v784_v63 = vadd.f32 (!%p911_p10), %v783_v55, %v782_v15 }
 0x1a1   : > { %v744_v59 = vsel %vm684_vm12, %v733_v60, 0.0  ;;  %v743_v0 = vadd.f32 %v742_v10, %v741_v46 }
 0x1a2   : > { %v786_v11 = vadd.f32 %v785_v48, %v784_v63 }
 0x1a3   : > { %v734_v33 = vld [vmem:[#allocation2 + $0x28] sm:$0xff]  ;;  %v745_v53 = vadd.f32 %v744_v59, %v743_v0 }
 0x1a4   : > { %v735_v50 = vld [vmem:[#allocation2 + $0x30] sm:$0xff]  ;;  %v746_v61 = vsel %vm684_vm12, %v734_v33, 0.0 }
 0x1a5   : > { %v748_v38 = vsel %vm684_vm12, %v735_v50, 0.0  ;;  %v747_v43 = vadd.f32 %v746_v61, %v745_v53 }
 0x1a7   : > { %v736_v2 = vld [vmem:[#allocation2 + $0x38] sm:$0xff]  ;;  %v749_v44 = vadd.f32 %v748_v38, %v747_v43 }
 0x1a8   : > { %v750_v1 = vsel %vm684_vm12, %v736_v2, 0.0 }
 0x1a9   : > { %v751_v3 = vadd.f32 %v750_v1, %v749_v44 }
 0x1ab   : > { %752 = vadd.xlane.f32.xlu0 %v751_v3 }
 0x1af   : > { %787 = vadd.xlane.f32.xlu0 %v786_v11 }
 0x238   : > { %v753_v58 = vpop.xlane.xlu0 %752 }
 0x239   : > { %v754_v19 = vrot.slane %v753_v58, 4 }
 0x23b   : > { %v755_v6 = vadd.f32 %v754_v19, %v753_v58 }
 0x23c   : > { %v788_v12 = vpop.xlane.xlu0 %787 }
 0x23d   : > { %v756_v9 = vrot.slane %v755_v6, 2  ;;  %v789_v21 = vrot.slane %v788_v12, 4 }
 0x23f   : > { %v790_v8 = vadd.f32 %v789_v21, %v788_v12  ;;  %v757_v28 = vadd.f32 %v756_v9, %v755_v6 }
 0x241   : > { %v791_v7 = vrot.slane %v790_v8, 2  ;;  %v758_v40 = vrot.slane %v757_v28, 1 }
 0x243   : > { %v792_v13 = vadd.f32 %v791_v7, %v790_v8  ;;  %v759_v30 = vadd.f32 %v758_v40, %v757_v28 }
 0x245   : > { %914 = vpush %v759_v30  ;;  %v793_v22 = vrot.slane %v792_v13, 1 }
 0x247   : > { %v794_v5 = vadd.f32 %v793_v22, %v792_v13 }
 0x249   : > { %916 = vpush %v794_v5 }
 0x276   : > { %s915_s15 = spop %914 }
 0x277   : > { %v761_v17 = vstv %s915_s15 }
 0x278   : > { %763 = vst.msk [vmem:[%s297_s10] sm:$0x1] %vm762_vm4, %v761_v17 }
 0x27a   : > { %s917_s25 = spop %916 }
 0x27b   : > { %v796_v27 = vstv %s917_s25 }
 0x27c   : > { %797 = vst.msk [vmem:[%s300_s13] sm:$0x1] %vm762_vm4, %v796_v27 }
 0x27d PF: > { %s15_s19 = sadd.s32 1, %s1033_s19   ;;  %s1488_s15 = smov %s1025_s17 }
 0x27e   : > { %p12_p11 = scmp.ge.s32.totalorder %s15_s19, 8   ;;  %s1489_s16 = smov %s1029_s18 }
 0x27f   : > { %s1490_s17 = smov %s1493_s20  ;;  %s1491_s18 = smov %s1497_s21 }
 0x280   :  { %14 = sbr.rel (!%p12_p11) target bundleno = 3 (0x3), region = 85 }

</bundles_post_ra>
